<compile_context>
chip_gen: v7x
topology: tpu7x:2x2x1
jax: 0.10.0
libtpu: 0.0.40
codegen_flags: <defaults>
</compile_context>

<pallas_src>
import functools

import jax
import jax.numpy as jnp
from jax import lax
from jax.experimental import pallas as pl
from jax.experimental.pallas import tpu as pltpu


# ---------------------------------------------------------------------------
# Helpers
# ---------------------------------------------------------------------------
def _pick_tile(dim, pref):
    """Use `pref` if it evenly divides `dim`, otherwise the full dim."""
    return pref if dim % pref == 0 else dim


def _vmem_limit(block_bytes):
    # Generous headroom for double-buffering + compiler scratch, clamped so it
    # is always safe on v7x (64 MiB physical VMEM per TensorCore).
    return int(min(max(4 * block_bytes, 32 << 20), 48 << 20))


# ---------------------------------------------------------------------------
# Kernel 1: tiled dense projection  o = x @ w (+ b)
# ---------------------------------------------------------------------------
def _matmul_kernel(x_ref, w_ref, o_ref, acc_ref):
    @pl.when(pl.program_id(2) == 0)
    def _init():
        acc_ref[...] = jnp.zeros_like(acc_ref)

    acc_ref[...] += jnp.dot(x_ref[...], w_ref[...],
                            preferred_element_type=jnp.float32)

    @pl.when(pl.program_id(2) == pl.num_programs(2) - 1)
    def _store():
        o_ref[...] = acc_ref[...].astype(o_ref.dtype)


def _matmul_bias_kernel(x_ref, w_ref, b_ref, o_ref, acc_ref):
    @pl.when(pl.program_id(2) == 0)
    def _init():
        acc_ref[...] = jnp.zeros_like(acc_ref)

    acc_ref[...] += jnp.dot(x_ref[...], w_ref[...],
                            preferred_element_type=jnp.float32)

    @pl.when(pl.program_id(2) == pl.num_programs(2) - 1)
    def _store():
        o_ref[...] = (acc_ref[...] + b_ref[...]).astype(o_ref.dtype)


def linear(x, w, b=None, *, tm=256, tn=256, tk=256):
    """x: [M, K] @ w: [K, N] (+ b: [N]) -> [M, N], tiled and pipelined."""
    M, K = x.shape
    K2, N = w.shape
    assert K == K2
    tm, tn, tk = _pick_tile(M, tm), _pick_tile(N, tn), _pick_tile(K, tk)
    grid = (M // tm, N // tn, K // tk)

    in_specs = [
        pl.BlockSpec((tm, tk), lambda i, j, k: (i, k)),
        pl.BlockSpec((tk, tn), lambda i, j, k: (k, j)),
    ]
    args = [x, w]
    if b is not None:
        in_specs.append(pl.BlockSpec((1, tn), lambda i, j, k: (0, j)))
        args.append(b.reshape(1, N))
        kernel = _matmul_bias_kernel
    else:
        kernel = _matmul_kernel

    isz = x.dtype.itemsize
    block_bytes = 2 * (tm * tk + tk * tn + tm * tn) * isz + tm * tn * 4
    cost = pl.CostEstimate(
        flops=2 * M * N * K,
        transcendentals=0,
        bytes_accessed=(M * K + K * N + M * N) * isz)

    return pl.pallas_call(
        kernel,
        out_shape=jax.ShapeDtypeStruct((M, N), x.dtype),
        grid_spec=pltpu.PrefetchScalarGridSpec(
            num_scalar_prefetch=0,
            grid=grid,
            in_specs=in_specs,
            out_specs=pl.BlockSpec((tm, tn), lambda i, j, k: (i, j)),
            scratch_shapes=[pltpu.VMEM((tm, tn), jnp.float32)]),
        compiler_params=pltpu.CompilerParams(
            dimension_semantics=("parallel", "parallel", "arbitrary"),
            vmem_limit_bytes=_vmem_limit(block_bytes)),
        cost_estimate=cost,
    )(*args)


# ---------------------------------------------------------------------------
# Kernel 2: attention over all heads of one (batch, q-tile) per grid step.
#   q block:  (1, tq, inner)      -- softmax scale already folded into Wq
#   kv block: (1, Lk, 2*inner)    -- [K | V] concatenated along the lane axis
#   o block:  (1, tq, inner)      -- lane-dense output (no head-merge transpose)
# ---------------------------------------------------------------------------
def _attn_kernel(q_ref, kv_ref, o_ref, *, num_heads, head_dim):
    q = q_ref[0]       # (tq, inner)
    kv = kv_ref[0]     # (Lk, 2*inner)
    inner = num_heads * head_dim
    dn = (((1,), (1,)), ((), ()))   # contract last (hd) dims; no k.T needed
    for h in range(num_heads):      # static loop, unrolled
        lo = h * head_dim
        hi = lo + head_dim
        qh = q[:, lo:hi]                    # (tq, hd)
        kh = kv[:, lo:hi]                   # (Lk, hd)
        vh = kv[:, inner + lo:inner + hi]   # (Lk, hd)
        s = lax.dot_general(qh, kh, dn, preferred_element_type=jnp.float32)
        s = s - jnp.max(s, axis=-1, keepdims=True)
        p = jnp.exp(s)
        p = p * pl.reciprocal(jnp.sum(p, axis=-1, keepdims=True), approx=True)
        oh = jnp.dot(p.astype(vh.dtype), vh, preferred_element_type=jnp.float32)
        o_ref[0, :, lo:hi] = oh.astype(o_ref.dtype)


def attention(q, kv, num_heads, head_dim, *, tq=128):
    """q: [B, Lq, H*hd], kv: [B, Lk, 2*H*hd] -> [B, Lq, H*hd]."""
    B, Lq, inner = q.shape
    _, Lk, two_inner = kv.shape
    assert inner == num_heads * head_dim and two_inner == 2 * inner
    tq = _pick_tile(Lq, tq)

    isz = q.dtype.itemsize
    block_bytes = (2 * (tq * inner + Lk * two_inner + tq * inner) * isz
                   + tq * Lk * 4 * 2)
    cost = pl.CostEstimate(
        flops=4 * B * num_heads * Lq * Lk * head_dim,
        transcendentals=B * num_heads * Lq * Lk,
        bytes_accessed=(2 * B * Lq * inner + B * Lk * two_inner) * isz)

    # TODO(synk): for long contexts convert to flash-style Lk tiling (online
    # softmax with m/l/acc VMEM scratch) so full K/V need not fit VMEM at once.
    return pl.pallas_call(
        functools.partial(_attn_kernel, num_heads=num_heads, head_dim=head_dim),
        out_shape=jax.ShapeDtypeStruct((B, Lq, inner), q.dtype),
        grid=(B, Lq // tq),
        in_specs=[
            pl.BlockSpec((1, tq, inner), lambda b, i: (b, i, 0)),
            pl.BlockSpec((1, Lk, two_inner), lambda b, i: (b, 0, 0)),
        ],
        out_specs=pl.BlockSpec((1, tq, inner), lambda b, i: (b, i, 0)),
        compiler_params=pltpu.CompilerParams(
            dimension_semantics=("parallel", "parallel"),
            vmem_limit_bytes=_vmem_limit(block_bytes)),
        cost_estimate=cost,
    )(q, kv)


# ---------------------------------------------------------------------------
# Wrapper: full MultiHeadAttention forward.
# ---------------------------------------------------------------------------
def mha_forward(queries, context, wq, wk, wv, wo, bo, num_heads, mask=None):
    # TODO(synk): the PyTorch forward accepts `mask` but never uses it.
    B, Lq, Dq = queries.shape
    _, Lk, Dc = context.shape
    inner = wq.shape[0]
    head_dim = inner // num_heads
    scale = head_dim ** (-0.5)
    assert wo.shape == (Dq, inner) and bo.shape == (Dq,)

    # nn.Linear: x @ W.T (Q/K/V have no bias).
    #  - softmax scale folded into Wq (exact: Q projection has no bias)
    #  - K and V fused into one matmul so `context` is read from HBM once
    wq_t = (wq * scale).T                        # [Dq, inner]
    wkv_t = jnp.concatenate([wk, wv], axis=0).T  # [Dc, 2*inner]

    q = linear(queries.reshape(B * Lq, Dq), wq_t).reshape(B, Lq, inner)
    kv = linear(context.reshape(B * Lk, Dc), wkv_t).reshape(B, Lk, 2 * inner)

    # Attention output comes back already as [B, Lq, inner] (heads merged on
    # the lane axis), so no transpose is needed before the output projection.
    o = attention(q, kv, num_heads, head_dim)

    out = linear(o.reshape(B * Lq, inner), wo.T, bo)
    return out.reshape(B, Lq, Dq)


# ---------------------------------------------------------------------------
# Pure-JAX reference for verification.
# ---------------------------------------------------------------------------
def mha_reference(queries, context, wq, wk, wv, wo, bo, num_heads):
    B, Lq, _ = queries.shape
    inner = wq.shape[0]
    hd = inner // num_heads
    scale = hd ** (-0.5)
    q = queries @ wq.T
    k = context @ wk.T
    v = context @ wv.T

    def split(t):
        b, l, _ = t.shape
        return t.reshape(b, l, num_heads, hd).transpose(0, 2, 1, 3)

    q, k, v = split(q), split(k), split(v)
    s = jnp.einsum("bhqd,bhkd->bhqk", q, k) * scale
    p = jax.nn.softmax(s, axis=-1)
    o = jnp.einsum("bhqk,bhkd->bhqd", p, v)
    o = o.transpose(0, 2, 1, 3).reshape(B, Lq, inner)
    return o @ wo.T + bo


if __name__ == "__main__":
    # Small, module-consistent shapes.
    B, Lq, Lk = 2, 8, 8
    query_dim, context_dim = 32, 32
    num_heads, head_dim = 4, 8
    inner_dim = num_heads * head_dim

    key = jax.random.PRNGKey(0)
    k1, k2, k3, k4, k5, k6, k7 = jax.random.split(key, 7)
    queries = jax.random.normal(k1, (B, Lq, query_dim), jnp.float32)
    context = jax.random.normal(k2, (B, Lk, context_dim), jnp.float32)

    # Deterministic parameter init (nn.Linear weight shape is [out, in]).
    wq = 0.1 * jax.random.normal(k3, (inner_dim, query_dim), jnp.float32)
    wk = 0.1 * jax.random.normal(k4, (inner_dim, context_dim), jnp.float32)
    wv = 0.1 * jax.random.normal(k5, (inner_dim, context_dim), jnp.float32)
    # NOTE: PyTorch __init__ zero-inits the output projection (output would be
    # identically zero); we use small nonzero values so the kernel path is
    # actually exercised, while keeping the forward math identical.
    wo = 0.1 * jax.random.normal(k6, (query_dim, inner_dim), jnp.float32)
    bo = 0.1 * jax.random.normal(k7, (query_dim,), jnp.float32)

    out = mha_forward(queries, context, wq, wk, wv, wo, bo, num_heads)
    out = jax.block_until_ready(out)

    ref = mha_reference(queries, context, wq, wk, wv, wo, bo, num_heads)
    assert out.shape == (B, Lq, query_dim), out.shape
    # Tolerance loosened slightly vs f32-exact because the softmax denominator
    # uses the EUP approximate reciprocal.
    assert jnp.allclose(out, ref, atol=2e-3, rtol=2e-3), (
        float(jnp.max(jnp.abs(out - ref))))

    print("KERNEL_OK")
</pallas_src>

<mosaic_0001>
module attributes {stable_mosaic.version = 11 : i64} {
  func.func @_matmul_kernel(%arg0: i32, %arg1: i32, %arg2: i32, %arg3: memref<16x32xf32, #tpu.memory_space<vmem>>, %arg4: memref<32x32xf32, #tpu.memory_space<vmem>>, %arg5: memref<16x32xf32, #tpu.memory_space<vmem>>, %arg6: memref<16x32xf32, #tpu.memory_space<vmem>>) attributes {dimension_semantics = [#tpu.dimension_semantics<parallel>, #tpu.dimension_semantics<parallel>, #tpu.dimension_semantics<arbitrary>], iteration_bounds = array<i64: 1, 1, 1>, scalar_prefetch = 0 : i64, scratch_operands = 1 : i64, tpu.core_type = #tpu.core_type<tc>, window_params = [{transform_indices = @transform_0, window_bounds = array<i64: 16, 32>}, {transform_indices = @transform_1, window_bounds = array<i64: 32, 32>}, {transform_indices = @transform_2, window_bounds = array<i64: 16, 32>}]} {
    %c0_i32 = arith.constant 0 : i32
    %0 = arith.cmpi eq, %arg2, %c0_i32 : i32
    %1 = arith.extui %0 : i1 to i32
    %c0_i32_0 = arith.constant 0 : i32
    %2 = arith.cmpi ne, %1, %c0_i32_0 : i32
    scf.if %2 {
      %cst_10 = arith.constant 0.000000e+00 : f32
      %12 = vector.broadcast %cst_10 : f32 to vector<16x32xf32>
      %c0_11 = arith.constant 0 : index
      %c0_12 = arith.constant 0 : index
      %13 = vector.load %arg6[%c0_11, %c0_12] : memref<16x32xf32, #tpu.memory_space<vmem>>, vector<16x32xf32>
      tpu.vector_store %arg6[%c0_11, %c0_12], %12 {strides = array<i32>} : memref<16x32xf32, #tpu.memory_space<vmem>>, vector<16x32xf32>,
    } else {
    }
    %c0 = arith.constant 0 : index
    %c0_1 = arith.constant 0 : index
    %3 = vector.load %arg6[%c0, %c0_1] : memref<16x32xf32, #tpu.memory_space<vmem>>, vector<16x32xf32>
    %c0_2 = arith.constant 0 : index
    %c0_3 = arith.constant 0 : index
    %4 = vector.load %arg3[%c0_2, %c0_3] : memref<16x32xf32, #tpu.memory_space<vmem>>, vector<16x32xf32>
    %c0_4 = arith.constant 0 : index
    %c0_5 = arith.constant 0 : index
    %5 = vector.load %arg4[%c0_4, %c0_5] : memref<32x32xf32, #tpu.memory_space<vmem>>, vector<32x32xf32>
    %cst = arith.constant dense<0.000000e+00> : vector<16x32xf32>
    %6 = tpu.matmul %4, %5, %cst {dimension_numbers = #tpu.dot_dimension_numbers<[1], [0], [0], [1], [0, 0, 1, 1], [], []>} : vector<16x32xf32>, vector<32x32xf32>, vector<16x32xf32> -> vector<16x32xf32>
    %7 = arith.addf %3, %6 : vector<16x32xf32>
    %c0_6 = arith.constant 0 : index
    %c0_7 = arith.constant 0 : index
    %8 = vector.load %arg6[%c0_6, %c0_7] : memref<16x32xf32, #tpu.memory_space<vmem>>, vector<16x32xf32>
    tpu.vector_store %arg6[%c0_6, %c0_7], %7 {strides = array<i32>} : memref<16x32xf32, #tpu.memory_space<vmem>>, vector<16x32xf32>,
    %c0_i32_8 = arith.constant 0 : i32
    %9 = arith.cmpi eq, %arg2, %c0_i32_8 : i32
    %10 = arith.extui %9 : i1 to i32
    %c0_i32_9 = arith.constant 0 : i32
    %11 = arith.cmpi ne, %10, %c0_i32_9 : i32
    scf.if %11 {
      %c0_10 = arith.constant 0 : index
      %c0_11 = arith.constant 0 : index
      %12 = vector.load %arg6[%c0_10, %c0_11] : memref<16x32xf32, #tpu.memory_space<vmem>>, vector<16x32xf32>
      %c0_12 = arith.constant 0 : index
      %c0_13 = arith.constant 0 : index
      %13 = vector.load %arg5[%c0_12, %c0_13] : memref<16x32xf32, #tpu.memory_space<vmem>>, vector<16x32xf32>
      tpu.vector_store %arg5[%c0_12, %c0_13], %12 {strides = array<i32>} : memref<16x32xf32, #tpu.memory_space<vmem>>, vector<16x32xf32>,
    } else {
    }
    return
  }
  func.func @transform_0(%arg0: i32, %arg1: i32, %arg2: i32) -> (i32, i32) {
    %c0_i32 = arith.constant 0 : i32
    return %arg0, %arg2 : i32, i32
  }
  func.func @transform_1(%arg0: i32, %arg1: i32, %arg2: i32) -> (i32, i32) {
    %c0_i32 = arith.constant 0 : i32
    return %arg2, %arg1 : i32, i32
  }
  func.func @transform_2(%arg0: i32, %arg1: i32, %arg2: i32) -> (i32, i32) {
    %c0_i32 = arith.constant 0 : i32
    return %arg0, %arg1 : i32, i32
  }
}

</mosaic_0001>

<bundles_post_ra>
// kernel: tpu_custom_call.1
= control target key start
LH: loop header
LB: loop body
LE: loop exit
PB: predicated region body
PF: predicated region fallthrough
CT: control target
= control target key end

     0   :  { %7 = vsyncpa [#allocation4], 0  ;;  %s345_s0 = inlined_call_operand.hbm [shape: f32[16,32], index: 0, kind: input, shape index: {}]   ;;  %s346_s1 = inlined_call_operand.hbm [shape: f32[32,32], index: 1, kind: input, shape index: {}]   ;;  %s347_s2 = inlined_call_operand.hbm [shape: f32[16,32], index: 2, kind: output, shape index: {}]  }
   0x1   :  { %8 = vsyncpa [#allocation7], 0 }
   0x2   :  { %9 = vsyncpa [#allocation5], 0  ;;  %s271_s9 = smov [#allocation3]   ;;  %s199_s13 = scalar_lea.hbm %s345_s0, 256 }
   0x3   :  { %s15_s10 = sshll.u32 %s271_s9, 4  ;;  %p200_p0 = scmp.ne.s32.totalorder %s345_s0, %s199_s13  ;;  %s16_s10 = int_to_ptr.vmem [resolvable:$true] %s15_s10 }
   0x4   :  { %p203_p1 = scmp.lt.u32.totalorder %s199_s13, %s345_s0 }
   0x6   :  { %p205_p2 = pnand %p203_p1, %p200_p0 }
   0x8   :  { %208 = shalt.err (!%p205_p2)
}
   0x9   :  { %s209_s18 = scalar_lea.vmem %s16_s10, 256  ;;  %p214_p4 = scmp.lt.s32.totalorder %s16_s10, %s16_s10 }
   0xa   :  { %p210_p3 = scmp.ne.s32.totalorder %s16_s10, %s209_s18  ;;  %p215_p5 = scmp.lt.s32.totalorder %s209_s18, %s209_s18 }
   0xc   :  { %p216_p6 = por %p215_p5, %p214_p4 }
   0xe   :  { %p217_p7 = pnand %p216_p6, %p210_p3 }
  0x10   :  { %220 = shalt.err (!%p217_p7)
}
  0x11   :  { %s272_s19 = smov 128   ;;  %s273_s20 = smov 8  }
  0x12   :  { %21 = dma.hbm_to_vmem [thread:$0]  %s345_s0, 256, %s16_s10, [#allocation4], %s272_s19, %s272_s19, %s273_s20  }
  0x13   :  { %s274_s23 = smov [#allocation6]   ;;  %s221_s27 = scalar_lea.hbm %s346_s1, 512 }
  0x14   :  { %s27_s24 = sshll.u32 %s274_s23, 4  ;;  %p222_p8 = scmp.ne.s32.totalorder %s346_s1, %s221_s27  ;;  %s28_s24 = int_to_ptr.vmem [resolvable:$true] %s27_s24 }
  0x15   :  { %p225_p9 = scmp.lt.u32.totalorder %s221_s27, %s346_s1 }
  0x17   :  { %p227_p10 = pnand %p225_p9, %p222_p8 }
  0x19   :  { %230 = shalt.err (!%p227_p10)
}
  0x1a   :  { %s231_s4 = scalar_lea.vmem %s28_s24, 512  ;;  %p236_p12 = scmp.lt.s32.totalorder %s28_s24, %s28_s24 }
  0x1b   :  { %p232_p11 = scmp.ne.s32.totalorder %s28_s24, %s231_s4  ;;  %p237_p13 = scmp.lt.s32.totalorder %s231_s4, %s231_s4 }
  0x1d   :  { %p238_p0 = por %p237_p13, %p236_p12 }
  0x1f   :  { %p239_p1 = pnand %p238_p0, %p232_p11 }
  0x21   :  { %242 = shalt.err (!%p239_p1)
}
  0x22   :  { %33 = dma.hbm_to_vmem [thread:$0]  %s346_s1, 512, %s28_s24, [#allocation7], %s272_s19, %s272_s19, %s273_s20  }
  0x23   :  { %265 = dma.done.wait [#allocation4], 256  }
  0x24   :  { %266 = vsyncadd [#allocation4], 4294967040 }
  0x25   :  { %267 = dma.done.wait [#allocation7], 512  }
  0x26   :  { %268 = vsyncadd [#allocation7], 4294966784  ;;  %vm44_vm0 = vcmask 261120   ;;  %v275_v0 = vmov 0.0   ;;  %v51_v1 = vld [vmem:[#allocation6] sm:$0xff]  ;;  %v52_v2 = vld [vmem:[#allocation6 + $0x8] sm:$0xff] }
  0x27   :  { %46 = vst.msk [vmem:[#allocation2 + $0x8] sm:$0xff] %vm44_vm0, %v275_v0  ;;  %45 = vst.msk [vmem:[#allocation2] sm:$0xff] %vm44_vm0, %v275_v0  ;;  %v53_v3 = vld [vmem:[#allocation6 + $0x10] sm:$0xff]  ;;  %v185_v4 = vpack.c.bf16 %v52_v2, %v51_v1  ;;  %v54_v5 = vld [vmem:[#allocation6 + $0x18] sm:$0xff]  ;;  %s276_s1 = smov [#allocation8]  }
  0x28   :  { %v49_v6 = vld [vmem:[#allocation3] sm:$0xff]  ;;  %v189_v7 = vpack.c.bf16 %v54_v5, %v53_v3  ;;  %v50_v8 = vld [vmem:[#allocation3 + $0x8] sm:$0xff]  ;;  %s153_s6 = sshll.u32 %s276_s1, 4  ;;  %s154_s6 = int_to_ptr.vmem [resolvable:$true] %s153_s6 }
  0x29   :  { %182 = vmatprep.mubr.msk.f32.mxu0 %vm44_vm0, %v49_v6  ;;  %186 = vmatprep.subr.bf16.mxu0 %v185_v4  ;;  %s243_s7 = scalar_lea.vmem %s154_s6, 256  ;;  %p248_p3 = scmp.lt.s32.totalorder %s154_s6, %s154_s6 }
  0x2a   :  { %188 = vmatpush3.bf16.msra.mxu0 %v185_v4  ;;  %p244_p2 = scmp.ne.s32.totalorder %s154_s6, %s243_s7  ;;  %p249_p4 = scmp.lt.s32.totalorder %s243_s7, %s243_s7 }
  0x2b   :  { %190 = vmatprep.subr.bf16.mxu0 %v189_v7 }
  0x2c   :  { %p250_p5 = por %p249_p4, %p248_p3 }
  0x2e   :  { %192 = vmatpush3.bf16.msra.mxu0 %v189_v7  ;;  %v48_v9 = vld [vmem:[#allocation2 + $0x8] sm:$0xff]  ;;  %v47_v10 = vld [vmem:[#allocation2] sm:$0xff]  ;;  %p251_p6 = pnand %p250_p5, %p244_p2 }
  0x31   :  { %183 = vmatmul.mubr.msk.f32.vlgmr.msra.gmra.mrb[0].mxu0 %vm44_vm0, %v50_v8 }
 0x104   :  { %v184_v11 = vpop.f32.mrb[0].mxu0 }
 0x105   :  { %v138_v12 = vadd.f32 %v184_v11, %v48_v9  ;;  %v128_v13 = vpop.f32.mrb[1].mxu0 }
 0x106   :  { %v137_v14 = vadd.f32 %v128_v13, %v47_v10 }
 0x107   :  { %140 = vst.msk [vmem:[#allocation2 + $0x8] sm:$0xff] %vm44_vm0, %v138_v12 }
 0x108   :  { %139 = vst.msk [vmem:[#allocation2] sm:$0xff] %vm44_vm0, %v137_v14 }
 0x10e   :  { %v145_v15 = vld [vmem:[#allocation2 + $0x8] sm:$0xff] }
 0x10f   :  { %v144_v16 = vld [vmem:[#allocation2] sm:$0xff]  ;;  %147 = vst.msk [vmem:[#allocation8 + $0x8] sm:$0xff] %vm44_vm0, %v145_v15 }
 0x110   :  { %146 = vst.msk [vmem:[#allocation8] sm:$0xff] %vm44_vm0, %v144_v16 }
 0x111   :  { %254 = shalt.err (!%p251_p6)
}
 0x112   :  { %s255_s10 = scalar_lea.hbm %s347_s2, 256 }
 0x113   :  { %p256_p7 = scmp.ne.s32.totalorder %s347_s2, %s255_s10  ;;  %p259_p8 = scmp.lt.u32.totalorder %s255_s10, %s347_s2 }
 0x115   :  { %p261_p9 = pnand %p259_p8, %p256_p7 }
 0x117   :  { %264 = shalt.err (!%p261_p9)
}
 0x118   :  { %159 = dma.vmem_to_hbm [thread:$0]  %s154_s6, 256, %s347_s2, [#allocation5], %s272_s19, %s272_s19, %s273_s20  }
 0x119   :  { %269 = dma.done.wait [#allocation5], 256  }
 0x11a   :  { %270 = vsyncadd [#allocation5], 4294967040 }
 0x11b   :  { %163 = vsyncpa [#allocation4], 1 }
 0x11c   :  { %164 = vsyncpa [#allocation7], 1 }
 0x11d   :  { %165 = vsyncpa [#allocation5], 1 }

</bundles_post_ra>
